<compile_context>
chip_gen: v7x
topology: tpu7x:2x2x1
jax: 0.10.0
libtpu: 0.0.40
codegen_flags: <defaults>
</compile_context>

<pallas_src>
import functools

import jax
import jax.numpy as jnp
from jax.experimental import pallas as pl
from jax.experimental.pallas import tpu as pltpu

EPS = 1e-5


def _round_up(x, m):
    return ((x + m - 1) // m) * m


def _choose_row_block(nc, hw_pad, itemsize, budget_bytes, row_mult, min_steps=4):
    """Largest row block whose double-buffered footprint fits the VMEM budget,
    while keeping at least ~min_steps grid steps when N*C is large enough."""
    # 4 arrays (2 in + 2 out) x 2 pipeline buffers
    bytes_per_row = 8 * hw_pad * itemsize
    r_max = max(row_mult, (budget_bytes // bytes_per_row) // row_mult * row_mult)
    if nc >= min_steps * row_mult:
        r_pref = max(row_mult, _round_up(-(-nc // min_steps), row_mult))
    else:
        r_pref = _round_up(nc, row_mult)
    return min(r_max, r_pref)


def _crossnorm_kernel(x1_ref, x2_ref, o1_ref, o2_ref, *, hw_true, hw_pad):
    # Upcast to f32 for the statistics (no-op for f32 inputs, required for bf16).
    x1 = x1_ref[...].astype(jnp.float32)  # (RB, HW_pad)
    x2 = x2_ref[...].astype(jnp.float32)

    inv_n = 1.0 / float(hw_true)
    inv_nm1 = 1.0 / float(max(hw_true - 1, 1))  # torch unbiased var; guard HW==1

    # Per-row means (padded lanes are zero, so the plain sum is already exact).
    mean1 = jnp.sum(x1, axis=-1, keepdims=True) * inv_n
    mean2 = jnp.sum(x2, axis=-1, keepdims=True) * inv_n

    d1 = x1 - mean1
    d2 = x2 - mean2

    if hw_true != hw_pad:
        # Mask out padded lanes in the variance reduction.
        lane = jax.lax.broadcasted_iota(jnp.int32, x1.shape, x1.ndim - 1)
        mask = (lane < hw_true).astype(jnp.float32)
        sq1 = d1 * d1 * mask
        sq2 = d2 * d2 * mask
    else:
        sq1 = d1 * d1
        sq2 = d2 * d2

    var1 = jnp.sum(sq1, axis=-1, keepdims=True) * inv_nm1 + EPS
    var2 = jnp.sum(sq2, axis=-1, keepdims=True) * inv_nm1 + EPS

    # Per-row rsqrt's (2 EUP ops per row); element path below is pure VPU.
    inv_std1 = jax.lax.rsqrt(var1)
    inv_std2 = jax.lax.rsqrt(var2)
    std1 = var1 * inv_std1  # sqrt(var1)
    std2 = var2 * inv_std2  # sqrt(var2)

    scale12 = std1 * inv_std2  # std1 / std2, shape (RB, 1)
    scale21 = std2 * inv_std1  # std2 / std1

    o1_ref[...] = (d2 * scale12 + mean2).astype(o1_ref.dtype)
    o2_ref[...] = (d1 * scale21 + mean1).astype(o2_ref.dtype)


def crossnorm_pallas(x1, x2, vmem_budget_bytes=40 << 20):
    """x1, x2: (N, C, H, W) float32 or bfloat16. Returns (x1_aug, x2_aug)."""
    assert x1.shape == x2.shape and x1.ndim == 4
    assert x1.dtype == x2.dtype
    N, C, H, W = x1.shape
    NC, HW = N * C, H * W
    assert HW >= 2, "CrossNorm needs at least 2 spatial positions (unbiased var)"

    itemsize = jnp.dtype(x1.dtype).itemsize
    row_mult = 8 if itemsize >= 4 else 16  # min sublane tile (f32: 8, bf16: 16)

    hw_pad = _round_up(HW, 128)            # lane-dense blocks (unmasked vst)
    row_block = _choose_row_block(NC, hw_pad, itemsize, vmem_budget_bytes, row_mult)
    nc_pad = _round_up(NC, row_block)
    # TODO(synk): very large HW (e.g. 512x512 f32) cannot hold a full spatial row
    # per block on v7x; that regime would need a two-pass (stats, then normalize)
    # kernel with a reduction grid axis.

    x1_2d = x1.reshape(NC, HW)
    x2_2d = x2.reshape(NC, HW)
    if (nc_pad, hw_pad) != (NC, HW):
        pad = ((0, nc_pad - NC), (0, hw_pad - HW))
        x1_2d = jnp.pad(x1_2d, pad)
        x2_2d = jnp.pad(x2_2d, pad)

    grid = (nc_pad // row_block,)
    spec = pl.BlockSpec((row_block, hw_pad), lambda i: (i, 0))

    # Double-buffered footprint of all 4 arrays, plus headroom; cap for v7x.
    footprint = 8 * row_block * hw_pad * itemsize
    vmem_limit = min(56 << 20, max(footprint + (4 << 20), 32 << 20))

    kernel = functools.partial(_crossnorm_kernel, hw_true=HW, hw_pad=hw_pad)

    o1_2d, o2_2d = pl.pallas_call(
        kernel,
        out_shape=(
            jax.ShapeDtypeStruct((nc_pad, hw_pad), x1.dtype),
            jax.ShapeDtypeStruct((nc_pad, hw_pad), x2.dtype),
        ),
        grid_spec=pltpu.PrefetchScalarGridSpec(
            num_scalar_prefetch=0,
            grid=grid,
            in_specs=[spec, spec],
            out_specs=(spec, spec),
        ),
        compiler_params=pltpu.CompilerParams(
            dimension_semantics=("parallel",),
            vmem_limit_bytes=vmem_limit,
        ),
    )(x1_2d, x2_2d)

    o1 = o1_2d[:NC, :HW].reshape(N, C, H, W)
    o2 = o2_2d[:NC, :HW].reshape(N, C, H, W)
    return o1, o2


def crossnorm_ref(x1, x2):
    """Pure-JAX reference mirroring the PyTorch code (crop='neither')."""
    N, C, H, W = x1.shape
    x1f = x1.reshape(N, C, -1).astype(jnp.float32)
    x2f = x2.reshape(N, C, -1).astype(jnp.float32)
    mean1 = x1f.mean(axis=2)[..., None, None]
    mean2 = x2f.mean(axis=2)[..., None, None]
    var1 = x1f.var(axis=2, ddof=1)[..., None, None] + EPS
    var2 = x2f.var(axis=2, ddof=1)[..., None, None] + EPS
    std1, std2 = jnp.sqrt(var1), jnp.sqrt(var2)
    x1_32 = x1.astype(jnp.float32).reshape(N, C, H, W)
    x2_32 = x2.astype(jnp.float32).reshape(N, C, H, W)
    n1 = (x1_32 - mean1) / std1
    n2 = (x2_32 - mean2) / std2
    x1_aug = (n2 * std1 + mean2).astype(x1.dtype)
    x2_aug = (n1 * std2 + mean1).astype(x2.dtype)
    return x1_aug, x2_aug


# TODO(synk): crop in {'style','content','both'} uses host-side rejection-sampled
# random bboxes and torch.randperm with data-dependent crop shapes; that glue is
# not implemented here (crop='neither', the CrossNorm() default, is deterministic).

if __name__ == "__main__":
    key = jax.random.PRNGKey(0)
    k1, k2, k3, k4 = jax.random.split(key, 4)

    # Primary small test: lane-aligned spatial size (16x16 = 256).
    N, C, H, W = 2, 4, 16, 16
    x1 = jax.random.normal(k1, (N, C, H, W), dtype=jnp.float32)
    x2 = 2.0 * jax.random.normal(k2, (N, C, H, W), dtype=jnp.float32) + 0.5

    o1, o2 = crossnorm_pallas(x1, x2)
    jax.block_until_ready((o1, o2))
    r1, r2 = crossnorm_ref(x1, x2)
    assert jnp.allclose(o1, r1, atol=1e-4, rtol=1e-4), "x1_aug mismatch"
    assert jnp.allclose(o2, r2, atol=1e-4, rtol=1e-4), "x2_aug mismatch"

    # Secondary test: non-128-multiple HW (14x14=196) and NC not a multiple of
    # the row block (3*5=15) exercises the lane mask + row-padding paths.
    N2, C2, H2, W2 = 3, 5, 14, 14
    y1 = jax.random.normal(k3, (N2, C2, H2, W2), dtype=jnp.float32)
    y2 = 0.7 * jax.random.normal(k4, (N2, C2, H2, W2), dtype=jnp.float32) - 1.3

    p1, p2 = crossnorm_pallas(y1, y2)
    jax.block_until_ready((p1, p2))
    q1, q2 = crossnorm_ref(y1, y2)
    assert jnp.allclose(p1, q1, atol=1e-4, rtol=1e-4), "padded x1_aug mismatch"
    assert jnp.allclose(p2, q2, atol=1e-4, rtol=1e-4), "padded x2_aug mismatch"

    print("KERNEL_OK")
</pallas_src>

<mosaic_0001>
module attributes {stable_mosaic.version = 11 : i64} {
  func.func @_crossnorm_kernel(%arg0: i32, %arg1: memref<8x256xf32, #tpu.memory_space<vmem>>, %arg2: memref<8x256xf32, #tpu.memory_space<vmem>>, %arg3: memref<8x256xf32, #tpu.memory_space<vmem>>, %arg4: memref<8x256xf32, #tpu.memory_space<vmem>>) attributes {dimension_semantics = [#tpu.dimension_semantics<parallel>], iteration_bounds = array<i64: 1>, scalar_prefetch = 0 : i64, scratch_operands = 0 : i64, tpu.core_type = #tpu.core_type<tc>, window_params = [{transform_indices = @transform_0, window_bounds = array<i64: 8, 256>}, {transform_indices = @transform_1, window_bounds = array<i64: 8, 256>}, {transform_indices = @transform_2, window_bounds = array<i64: 8, 256>}, {transform_indices = @transform_3, window_bounds = array<i64: 8, 256>}]} {
    %c0 = arith.constant 0 : index
    %c0_0 = arith.constant 0 : index
    %0 = vector.load %arg1[%c0, %c0_0] : memref<8x256xf32, #tpu.memory_space<vmem>>, vector<8x256xf32>
    %c0_1 = arith.constant 0 : index
    %c0_2 = arith.constant 0 : index
    %1 = vector.load %arg2[%c0_1, %c0_2] : memref<8x256xf32, #tpu.memory_space<vmem>>, vector<8x256xf32>
    %cst = arith.constant dense<0.000000e+00> : vector<8xf32>
    %2 = vector.multi_reduction <add>, %0, %cst [1] : vector<8x256xf32> to vector<8xf32>
    %3 = vector.shape_cast %2 : vector<8xf32> to vector<8x1xf32>
    %cst_3 = arith.constant 3.906250e-03 : f32
    %4 = vector.broadcast %cst_3 : f32 to vector<8x1xf32>
    %5 = arith.mulf %3, %4 : vector<8x1xf32>
    %cst_4 = arith.constant dense<0.000000e+00> : vector<8xf32>
    %6 = vector.multi_reduction <add>, %1, %cst_4 [1] : vector<8x256xf32> to vector<8xf32>
    %7 = vector.shape_cast %6 : vector<8xf32> to vector<8x1xf32>
    %cst_5 = arith.constant 3.906250e-03 : f32
    %8 = vector.broadcast %cst_5 : f32 to vector<8x1xf32>
    %9 = arith.mulf %7, %8 : vector<8x1xf32>
    %10 = vector.broadcast %5 : vector<8x1xf32> to vector<8x256xf32>
    %11 = arith.subf %0, %10 : vector<8x256xf32>
    %12 = vector.broadcast %9 : vector<8x1xf32> to vector<8x256xf32>
    %13 = arith.subf %1, %12 : vector<8x256xf32>
    %14 = arith.mulf %11, %11 : vector<8x256xf32>
    %15 = arith.mulf %13, %13 : vector<8x256xf32>
    %cst_6 = arith.constant dense<0.000000e+00> : vector<8xf32>
    %16 = vector.multi_reduction <add>, %14, %cst_6 [1] : vector<8x256xf32> to vector<8xf32>
    %17 = vector.shape_cast %16 : vector<8xf32> to vector<8x1xf32>
    %cst_7 = arith.constant 0.00392156886 : f32
    %18 = vector.broadcast %cst_7 : f32 to vector<8x1xf32>
    %19 = arith.mulf %17, %18 : vector<8x1xf32>
    %cst_8 = arith.constant 9.99999974E-6 : f32
    %20 = vector.broadcast %cst_8 : f32 to vector<8x1xf32>
    %21 = arith.addf %19, %20 : vector<8x1xf32>
    %cst_9 = arith.constant dense<0.000000e+00> : vector<8xf32>
    %22 = vector.multi_reduction <add>, %15, %cst_9 [1] : vector<8x256xf32> to vector<8xf32>
    %23 = vector.shape_cast %22 : vector<8xf32> to vector<8x1xf32>
    %cst_10 = arith.constant 0.00392156886 : f32
    %24 = vector.broadcast %cst_10 : f32 to vector<8x1xf32>
    %25 = arith.mulf %23, %24 : vector<8x1xf32>
    %cst_11 = arith.constant 9.99999974E-6 : f32
    %26 = vector.broadcast %cst_11 : f32 to vector<8x1xf32>
    %27 = arith.addf %25, %26 : vector<8x1xf32>
    %28 = math.rsqrt %21 : vector<8x1xf32>
    %29 = math.rsqrt %27 : vector<8x1xf32>
    %30 = arith.mulf %21, %28 : vector<8x1xf32>
    %31 = arith.mulf %27, %29 : vector<8x1xf32>
    %32 = arith.mulf %30, %29 : vector<8x1xf32>
    %33 = arith.mulf %31, %28 : vector<8x1xf32>
    %34 = vector.broadcast %32 : vector<8x1xf32> to vector<8x256xf32>
    %35 = arith.mulf %13, %34 : vector<8x256xf32>
    %36 = vector.broadcast %9 : vector<8x1xf32> to vector<8x256xf32>
    %37 = arith.addf %35, %36 : vector<8x256xf32>
    %c0_12 = arith.constant 0 : index
    %c0_13 = arith.constant 0 : index
    %38 = vector.load %arg3[%c0_12, %c0_13] : memref<8x256xf32, #tpu.memory_space<vmem>>, vector<8x256xf32>
    tpu.vector_store %arg3[%c0_12, %c0_13], %37 {strides = array<i32>} : memref<8x256xf32, #tpu.memory_space<vmem>>, vector<8x256xf32>,
    %39 = vector.broadcast %33 : vector<8x1xf32> to vector<8x256xf32>
    %40 = arith.mulf %11, %39 : vector<8x256xf32>
    %41 = vector.broadcast %5 : vector<8x1xf32> to vector<8x256xf32>
    %42 = arith.addf %40, %41 : vector<8x256xf32>
    %c0_14 = arith.constant 0 : index
    %c0_15 = arith.constant 0 : index
    %43 = vector.load %arg4[%c0_14, %c0_15] : memref<8x256xf32, #tpu.memory_space<vmem>>, vector<8x256xf32>
    tpu.vector_store %arg4[%c0_14, %c0_15], %42 {strides = array<i32>} : memref<8x256xf32, #tpu.memory_space<vmem>>, vector<8x256xf32>,
    return
  }
  func.func @transform_0(%arg0: i32) -> (i32, i32) {
    %c0_i32 = arith.constant 0 : i32
    %c0_i32_0 = arith.constant 0 : i32
    return %arg0, %c0_i32 : i32, i32
  }
  func.func @transform_1(%arg0: i32) -> (i32, i32) {
    %c0_i32 = arith.constant 0 : i32
    %c0_i32_0 = arith.constant 0 : i32
    return %arg0, %c0_i32 : i32, i32
  }
  func.func @transform_2(%arg0: i32) -> (i32, i32) {
    %c0_i32 = arith.constant 0 : i32
    %c0_i32_0 = arith.constant 0 : i32
    return %arg0, %c0_i32 : i32, i32
  }
  func.func @transform_3(%arg0: i32) -> (i32, i32) {
    %c0_i32 = arith.constant 0 : i32
    %c0_i32_0 = arith.constant 0 : i32
    return %arg0, %c0_i32 : i32, i32
  }
}

</mosaic_0001>

<bundles_post_ra>
// kernel: tpu_custom_call.1
= control target key start
LH: loop header
LB: loop body
LE: loop exit
PB: predicated region body
PF: predicated region fallthrough
CT: control target
= control target key end

     0   :  { %9 = vsyncpa [#allocation3], 0  ;;  %s293_s0 = inlined_call_operand.hbm [shape: f32[8,256], index: 0, kind: input, shape index: {}]   ;;  %s294_s1 = inlined_call_operand.hbm [shape: f32[8,256], index: 1, kind: input, shape index: {}]   ;;  %s295_s2 = inlined_call_operand.hbm [shape: f32[8,256], index: 2, kind: output, shape index: {0}]   ;;  %s296_s3 = inlined_call_operand.hbm [shape: f32[8,256], index: 3, kind: output, shape index: {1}]  }
   0x1   :  { %10 = vsyncpa [#allocation6], 0 }
   0x2   :  { %11 = vsyncpa [#allocation4], 0 }
   0x3   :  { %12 = vsyncpa [#allocation9], 0  ;;  %s221_s12 = smov [#allocation2]   ;;  %s222_s14 = smov [#allocation5]  }
   0x4   :  { %s19_s13 = sshll.u32 %s221_s12, 4  ;;  %s29_s15 = sshll.u32 %s222_s14, 4  ;;  %s20_s13 = int_to_ptr.vmem [resolvable:$true] %s19_s13  ;;  %s30_s15 = int_to_ptr.vmem [resolvable:$true] %s29_s15 }
   0x5   :  { %s125_s18 = scalar_lea.hbm %s293_s0, 256 }
   0x6   :  { %p126_p0 = scmp.ne.s32.totalorder %s293_s0, %s125_s18  ;;  %p129_p1 = scmp.lt.u32.totalorder %s125_s18, %s293_s0 }
   0x8   :  { %p131_p2 = pnand %p129_p1, %p126_p0 }
   0xa   :  { %134 = shalt.err (!%p131_p2)
}
   0xb   :  { %s135_s23 = scalar_lea.vmem %s20_s13, 256  ;;  %p140_p4 = scmp.lt.s32.totalorder %s20_s13, %s20_s13 }
   0xc   :  { %p136_p3 = scmp.ne.s32.totalorder %s20_s13, %s135_s23  ;;  %p141_p5 = scmp.lt.s32.totalorder %s135_s23, %s135_s23 }
   0xe   :  { %p142_p6 = por %p141_p5, %p140_p4 }
  0x10   :  { %p143_p7 = pnand %p142_p6, %p136_p3 }
  0x12   :  { %146 = shalt.err (!%p143_p7)
}
  0x13   :  { %22 = dma.hbm_to_vmem [thread:$0]  %s293_s0, 256, %s20_s13, [#allocation3]  }
  0x14   :  { %s147_s28 = scalar_lea.hbm %s294_s1, 256 }
  0x15   :  { %p148_p8 = scmp.ne.s32.totalorder %s294_s1, %s147_s28  ;;  %p151_p9 = scmp.lt.u32.totalorder %s147_s28, %s294_s1 }
  0x17   :  { %p153_p10 = pnand %p151_p9, %p148_p8 }
  0x19   :  { %156 = shalt.err (!%p153_p10)
}
  0x1a   :  { %s157_s6 = scalar_lea.vmem %s30_s15, 256  ;;  %p162_p12 = scmp.lt.s32.totalorder %s30_s15, %s30_s15 }
  0x1b   :  { %p158_p11 = scmp.ne.s32.totalorder %s30_s15, %s157_s6  ;;  %p163_p13 = scmp.lt.s32.totalorder %s157_s6, %s157_s6 }
  0x1d   :  { %p164_p0 = por %p163_p13, %p162_p12 }
  0x1f   :  { %p165_p1 = pnand %p164_p0, %p158_p11 }
  0x21   :  { %168 = shalt.err (!%p165_p1)
}
  0x22   :  { %32 = dma.hbm_to_vmem [thread:$0]  %s294_s1, 256, %s30_s15, [#allocation6]  }
  0x23   :  { %213 = dma.done.wait [#allocation3], 256  }
  0x24   :  { %214 = vsyncadd [#allocation3], 4294967040 }
  0x25   :  { %215 = dma.done.wait [#allocation6], 256  }
  0x26   :  { %216 = vsyncadd [#allocation6], 4294967040  ;;  %v39_v0 = vld [vmem:[#allocation2] sm:$0xff]  ;;  %v40_v1 = vld [vmem:[#allocation2 + $0x8] sm:$0xff]  ;;  %s223_s1 = smov [#allocation7]   ;;  %s224_s9 = smov [#allocation8]  }
  0x27   :  { %v41_v2 = vld [vmem:[#allocation5] sm:$0xff]  ;;  %v43_v3 = vadd.f32 %v40_v1, %v39_v0  ;;  %v42_v4 = vld [vmem:[#allocation5 + $0x8] sm:$0xff]  ;;  %s93_s8 = sshll.u32 %s223_s1, 4  ;;  %s103_s10 = sshll.u32 %s224_s9, 4  ;;  %s94_s8 = int_to_ptr.vmem [resolvable:$true] %s93_s8  ;;  %s104_s10 = int_to_ptr.vmem [resolvable:$true] %s103_s10 }
  0x28   :  { %v47_v5 = vadd.f32 %v42_v4, %v41_v2  ;;  %s169_s11 = scalar_lea.vmem %s94_s8, 256  ;;  %p174_p3 = scmp.lt.s32.totalorder %s94_s8, %s94_s8 }
  0x29   :  { %44 = vadd.xlane.f32.xlu0 %v43_v3  ;;  %p170_p2 = scmp.ne.s32.totalorder %s94_s8, %s169_s11  ;;  %p175_p4 = scmp.lt.s32.totalorder %s169_s11, %s169_s11 }
  0x2b   :  { %p176_p5 = por %p175_p4, %p174_p3 }
  0x2d   :  { %48 = vadd.xlane.f32.xlu0 %v47_v5  ;;  %p177_p6 = pnand %p176_p5, %p170_p2 }
  0xb6   :  { %v45_v6 = vpop.xlane.xlu0 %44 }
  0xb7   :  { %v46_v7 = vmul.f32 0.00390625, %v45_v6 }
  0xb9   :  { %v51_v8 = vsub.f32 %v39_v0, %v46_v7  ;;  %v52_v9 = vsub.f32 %v40_v1, %v46_v7 }
  0xba   :  { %v49_v10 = vpop.xlane.xlu0 %48 }
  0xbb   :  { %v50_v11 = vmul.f32 0.00390625, %v49_v10  ;;  %v55_v12 = vmul.f32 %v51_v8, %v51_v8  ;;  %v56_v13 = vmul.f32 %v52_v9, %v52_v9 }
  0xbd   :  { %v59_v14 = vadd.f32 %v56_v13, %v55_v12  ;;  %v53_v15 = vsub.f32 %v41_v2, %v50_v11  ;;  %v54_v16 = vsub.f32 %v42_v4, %v50_v11 }
  0xbf   :  { %60 = vadd.xlane.f32.xlu1 %v59_v14  ;;  %v57_v17 = vmul.f32 %v53_v15, %v53_v15  ;;  %v58_v18 = vmul.f32 %v54_v16, %v54_v16 }
  0xc1   :  { %v64_v19 = vadd.f32 %v58_v18, %v57_v17 }
  0xc3   :  { %65 = vadd.xlane.f32.xlu1 %v64_v19 }
 0x14c   :  { %v61_v20 = vpop.xlane.xlu1 %60 }
 0x14d   :  { %v62_v21 = vmul.f32 0.003921569, %v61_v20 }
 0x14f   :  { %v63_v22 = vadd.f32 1e-05, %v62_v21 }
 0x150   :  { %v66_v23 = vpop.xlane.xlu1 %65 }
 0x151   :  { %121 = vrsqrt.f32 %v63_v22  ;;  %v67_v24 = vmul.f32 0.003921569, %v66_v23 }
 0x153   :  { %v68_v25 = vadd.f32 1e-05, %v67_v24 }
 0x155   :  { %123 = vrsqrt.f32 %v68_v25 }
 0x15b   :  { %v122_v26 = vpop.eup %121 }
 0x15c   :  { %v71_v27 = vmul.f32 %v122_v26, %v63_v22 }
 0x15f   :  { %v124_v28 = vpop.eup %123 }
 0x160   :  { %v72_v29 = vmul.f32 %v124_v28, %v68_v25  ;;  %v73_v30 = vmul.f32 %v124_v28, %v71_v27 }
 0x162   :  { %v74_v31 = vmul.f32 %v122_v26, %v72_v29  ;;  %v75_v32 = vmul.f32 %v73_v30, %v53_v15  ;;  %v76_v33 = vmul.f32 %v73_v30, %v54_v16 }
 0x164   :  { %v81_v34 = vmul.f32 %v74_v31, %v51_v8  ;;  %v82_v35 = vmul.f32 %v74_v31, %v52_v9  ;;  %v77_v36 = vadd.f32 %v75_v32, %v50_v11  ;;  %v78_v37 = vadd.f32 %v76_v33, %v50_v11 }
 0x166   :  { %79 = vst [vmem:[#allocation7] sm:$0xff] %v77_v36  ;;  %80 = vst [vmem:[#allocation7 + $0x8] sm:$0xff] %v78_v37  ;;  %v83_v38 = vadd.f32 %v81_v34, %v46_v7  ;;  %v84_v39 = vadd.f32 %v82_v35, %v46_v7 }
 0x167   :  { %180 = shalt.err (!%p177_p6)
}
 0x168   :  { %s181_s14 = scalar_lea.hbm %s295_s2, 256 }
 0x169   :  { %p182_p7 = scmp.ne.s32.totalorder %s295_s2, %s181_s14  ;;  %p185_p8 = scmp.lt.u32.totalorder %s181_s14, %s295_s2 }
 0x16b   :  { %p187_p9 = pnand %p185_p8, %p182_p7 }
 0x16d   :  { %190 = shalt.err (!%p187_p9)
}
 0x16e   :  { %96 = dma.vmem_to_hbm [thread:$0]  %s94_s8, 256, %s295_s2, [#allocation4]   ;;  %85 = vst [vmem:[#allocation8] sm:$0xff] %v83_v38  ;;  %86 = vst [vmem:[#allocation8 + $0x8] sm:$0xff] %v84_v39 }
 0x16f   :  { %s191_s21 = scalar_lea.vmem %s104_s10, 256  ;;  %p196_p11 = scmp.lt.s32.totalorder %s104_s10, %s104_s10 }
 0x170   :  { %p192_p10 = scmp.ne.s32.totalorder %s104_s10, %s191_s21  ;;  %p197_p12 = scmp.lt.s32.totalorder %s191_s21, %s191_s21 }
 0x172   :  { %p198_p13 = por %p197_p12, %p196_p11 }
 0x174   :  { %p199_p0 = pnand %p198_p13, %p192_p10 }
 0x176   :  { %202 = shalt.err (!%p199_p0)
}
 0x177   :  { %s203_s24 = scalar_lea.hbm %s296_s3, 256 }
 0x178   :  { %p204_p1 = scmp.ne.s32.totalorder %s296_s3, %s203_s24  ;;  %p207_p2 = scmp.lt.u32.totalorder %s203_s24, %s296_s3 }
 0x17a   :  { %p209_p3 = pnand %p207_p2, %p204_p1 }
 0x17c   :  { %212 = shalt.err (!%p209_p3)
}
 0x17d   :  { %106 = dma.vmem_to_hbm [thread:$0]  %s104_s10, 256, %s296_s3, [#allocation9]  }
 0x17e   :  { %217 = dma.done.wait [#allocation4], 256  }
 0x17f   :  { %218 = vsyncadd [#allocation4], 4294967040 }
 0x180   :  { %219 = dma.done.wait [#allocation9], 256  }
 0x181   :  { %220 = vsyncadd [#allocation9], 4294967040 }
 0x182   :  { %113 = vsyncpa [#allocation3], 1 }
 0x183   :  { %114 = vsyncpa [#allocation6], 1 }
 0x184   :  { %115 = vsyncpa [#allocation4], 1 }
 0x185   :  { %116 = vsyncpa [#allocation9], 1 }

</bundles_post_ra>
